<compile_context>
chip_gen: v7x
topology: tpu7x:2x2x1
jax: 0.10.0
libtpu: 0.0.40
codegen_flags: <defaults>
</compile_context>

<pallas_src>
import functools

import jax
import jax.numpy as jnp
import numpy as np
from jax.experimental import pallas as pl
from jax.experimental.pallas import tpu as pltpu


def _round_up(x, m):
    return ((x + m - 1) // m) * m


def mlp_relu_dynamics_kernel(x_ref, w_in_ref, b_in_ref, wh_ref, bh_ref,
                             w_out_ref, b_out_ref, o_ref):
    """One batch tile of the full MLP.  h is carried in registers (no scratch)."""
    # Input layer: bf16 matmul on the MXU, f32 accumulate, f32 bias, NO activation.
    h = (jnp.dot(x_ref[...], w_in_ref[...], preferred_element_type=jnp.float32)
         + b_in_ref[...])

    # Hidden layers: Linear + ReLU.  num_layers is static -> unrolled Python loop.
    num_layers = wh_ref.shape[0]
    for layer in range(num_layers):
        h = jnp.maximum(
            jnp.dot(h.astype(wh_ref.dtype), wh_ref[layer],
                    preferred_element_type=jnp.float32)
            + bh_ref[layer],
            0.0)

    # Output layer (no activation).
    y = (jnp.dot(h.astype(w_out_ref.dtype), w_out_ref[...],
                 preferred_element_type=jnp.float32)
         + b_out_ref[...])
    o_ref[...] = y.astype(o_ref.dtype)


def prepare_params(params, *, compute_dtype=jnp.bfloat16):
    """Pad feature dims to multiples of 128 and cast weights to compute_dtype.

    Done ONCE (outside the per-call path).  Zero padding keeps the math exact.
    params (float32, Linear weights transposed vs. PyTorch):
      w_in  (input_dim, H), b_in  (1, H)
      w_h   (L, H, H),      b_h   (L, 1, H)
      w_out (H, H),         b_out (1, H)
    """
    w_in, b_in = params["w_in"], params["b_in"]
    w_h, b_h = params["w_h"], params["b_h"]
    w_out, b_out = params["w_out"], params["b_out"]

    D_in, H = w_in.shape
    Dp = _round_up(D_in, 128)
    Hp = _round_up(H, 128)

    prepared = {
        "w_in": jnp.pad(w_in, ((0, Dp - D_in), (0, Hp - H))).astype(compute_dtype),
        "b_in": jnp.pad(b_in, ((0, 0), (0, Hp - H))).astype(jnp.float32),
        "w_h": jnp.pad(w_h, ((0, 0), (0, Hp - H), (0, Hp - H))).astype(compute_dtype),
        "b_h": jnp.pad(b_h, ((0, 0), (0, 0), (0, Hp - H))).astype(jnp.float32),
        "w_out": jnp.pad(w_out, ((0, Hp - H), (0, Hp - H))).astype(compute_dtype),
        "b_out": jnp.pad(b_out, ((0, 0), (0, Hp - H))).astype(jnp.float32),
    }
    return prepared


def _vmem_capacity_bytes():
    try:
        return int(pltpu.get_tpu_info().vmem_capacity_bytes)
    except Exception:
        return 64 * 2**20   # conservative: fits every TPU generation


def mlp_relu_dynamics(x, prepared, *, hidden, batch_tile=None,
                      out_dtype=jnp.float32):
    """Run the MLP forward pass with a single Pallas kernel.

    x: (B, input_dim) float32.  prepared: output of prepare_params.
    Returns (B, hidden) out_dtype.
    """
    w_in, b_in = prepared["w_in"], prepared["b_in"]
    w_h, b_h = prepared["w_h"], prepared["b_h"]
    w_out, b_out = prepared["w_out"], prepared["b_out"]

    B, D_in = x.shape
    Dp, Hp = w_in.shape
    L = w_h.shape[0]
    compute_dtype = w_in.dtype
    wsz = jnp.dtype(compute_dtype).itemsize
    osz = jnp.dtype(out_dtype).itemsize

    # Batch tiling: >= 2 grid steps (both v7x TCs busy), 16-aligned sublanes,
    # minimal padding waste, and bounded tile size to keep vreg pressure sane.
    if batch_tile is None:
        n_steps = max(2, pl.cdiv(B, 512))
        batch_tile = min(_round_up(pl.cdiv(B, n_steps), 16), 512)
    batch_tile = max(16, _round_up(batch_tile, 16))
    Bp = _round_up(B, batch_tile)
    grid = (Bp // batch_tile,)

    # Only the per-call input is padded/cast here (weights were prepared once).
    x_p = jnp.pad(x, ((0, Bp - B), (0, Dp - D_in))).astype(compute_dtype)

    # Advisory cost estimate for XLA's scheduler around the custom call.
    flops = 2 * Bp * (Dp * Hp + L * Hp * Hp + Hp * Hp)
    bytes_accessed = (
        Bp * Dp * wsz                                   # x
        + (Dp * Hp + L * Hp * Hp + Hp * Hp) * wsz       # weights (read once)
        + (Hp + L * Hp + Hp) * 4                        # biases (f32)
        + Bp * Hp * osz)                                # output

    # VMEM budget: single-buffered resident weights/biases (Buffered(1)),
    # double-buffered x / out tiles, plus modest compiler headroom.
    weight_bytes = (Dp * Hp + L * Hp * Hp + Hp * Hp) * wsz
    bias_bytes = (Hp + L * Hp + Hp) * 4
    io_bytes = 2 * (batch_tile * Dp * wsz + batch_tile * Hp * osz)
    vmem_needed = weight_bytes + bias_bytes + io_bytes
    cap = _vmem_capacity_bytes()
    vmem_limit = int(min(max(int(vmem_needed * 1.25) + (4 << 20), 16 << 20),
                         int(cap * 0.85)))

    resident = functools.partial(pl.BlockSpec, pipeline_mode=pl.Buffered(1))

    out = pl.pallas_call(
        mlp_relu_dynamics_kernel,
        out_shape=jax.ShapeDtypeStruct((Bp, Hp), out_dtype),
        grid_spec=pltpu.PrefetchScalarGridSpec(
            num_scalar_prefetch=0,
            grid=grid,
            in_specs=[
                pl.BlockSpec((batch_tile, Dp), lambda i: (i, 0)),      # x tile
                resident((Dp, Hp), lambda i: (0, 0)),                  # w_in
                resident((1, Hp), lambda i: (0, 0)),                   # b_in
                resident((L, Hp, Hp), lambda i: (0, 0, 0)),            # stacked hidden W
                resident((L, 1, Hp), lambda i: (0, 0, 0)),             # stacked hidden b
                resident((Hp, Hp), lambda i: (0, 0)),                  # w_out
                resident((1, Hp), lambda i: (0, 0)),                   # b_out
            ],
            out_specs=pl.BlockSpec((batch_tile, Hp), lambda i: (i, 0)),
        ),
        compiler_params=pltpu.CompilerParams(
            dimension_semantics=("parallel",),
            vmem_limit_bytes=vmem_limit,
        ),
        cost_estimate=pl.CostEstimate(
            flops=flops, transcendentals=0, bytes_accessed=bytes_accessed),
    )(x_p, w_in, b_in, w_h, b_h, w_out, b_out)

    return out[:B, :hidden]


def init_params(key, input_dim, hidden_size, num_layers):
    """Deterministic init mimicking nn.Linear's U(-1/sqrt(fan_in), 1/sqrt(fan_in))."""
    keys = jax.random.split(key, 2 * (num_layers + 2))

    def linear(kw, kb, fan_in, fan_out):
        bound = 1.0 / np.sqrt(fan_in)
        w = jax.random.uniform(kw, (fan_in, fan_out), jnp.float32, -bound, bound)
        b = jax.random.uniform(kb, (1, fan_out), jnp.float32, -bound, bound)
        return w, b

    w_in, b_in = linear(keys[0], keys[1], input_dim, hidden_size)
    whs, bhs = [], []
    for l in range(num_layers):
        w, b = linear(keys[2 + 2 * l], keys[3 + 2 * l], hidden_size, hidden_size)
        whs.append(w)
        bhs.append(b[None])  # (1, 1, H)
    w_out, b_out = linear(keys[-2], keys[-1], hidden_size, hidden_size)
    return {
        "w_in": w_in, "b_in": b_in,
        "w_h": jnp.concatenate([w[None] for w in whs], axis=0),   # (L, H, H)
        "b_h": jnp.concatenate(bhs, axis=0),                      # (L, 1, H)
        "w_out": w_out, "b_out": b_out,
    }


def mlp_reference(x, params):
    """Pure-JAX f32 reference."""
    h = x @ params["w_in"] + params["b_in"]
    for l in range(params["w_h"].shape[0]):
        h = jnp.maximum(h @ params["w_h"][l] + params["b_h"][l], 0.0)
    return h @ params["w_out"] + params["b_out"]


if __name__ == "__main__":
    input_dim = 16
    hidden_size = 32
    num_layers = 2
    batch = 200          # NOT a multiple of the tile -> exercises padding; grid=(2,)

    key = jax.random.PRNGKey(0)
    kx, kp = jax.random.split(key)
    x = jax.random.normal(kx, (batch, input_dim), jnp.float32)
    params = init_params(kp, input_dim, hidden_size, num_layers)

    # Weight pad/cast hoisted out of the per-call path (done once).
    prepared = prepare_params(params)

    run = jax.jit(functools.partial(mlp_relu_dynamics, hidden=hidden_size))
    out = jax.block_until_ready(run(x, prepared))

    ref = mlp_reference(x, params)
    # bf16 matmuls with f32 accumulation -> loosened tolerance vs. the f32 reference.
    np.testing.assert_allclose(np.asarray(out), np.asarray(ref), rtol=5e-2, atol=5e-2)

    print("KERNEL_OK")
</pallas_src>

<mosaic_0001>
module attributes {stable_mosaic.version = 11 : i64} {
  func.func @mlp_relu_dynamics_kernel(%arg0: i32, %arg1: memref<112x128xbf16, #tpu.memory_space<vmem>>, %arg2: memref<128x128xbf16, #tpu.memory_space<vmem>>, %arg3: memref<1x128xf32, #tpu.memory_space<vmem>>, %arg4: memref<2x128x128xbf16, #tpu.memory_space<vmem>>, %arg5: memref<2x1x128xf32, #tpu.memory_space<vmem>>, %arg6: memref<128x128xbf16, #tpu.memory_space<vmem>>, %arg7: memref<1x128xf32, #tpu.memory_space<vmem>>, %arg8: memref<112x128xf32, #tpu.memory_space<vmem>>) attributes {dimension_semantics = [#tpu.dimension_semantics<parallel>], iteration_bounds = array<i64: 2>, scalar_prefetch = 0 : i64, scratch_operands = 0 : i64, tpu.core_type = #tpu.core_type<tc>, window_params = [{transform_indices = @transform_0, window_bounds = array<i64: 112, 128>}, {pipeline_mode = #tpu.pipeline_mode<synchronous>, transform_indices = @transform_1, window_bounds = array<i64: 128, 128>}, {pipeline_mode = #tpu.pipeline_mode<synchronous>, transform_indices = @transform_2, window_bounds = array<i64: 1, 128>}, {pipeline_mode = #tpu.pipeline_mode<synchronous>, transform_indices = @transform_3, window_bounds = array<i64: 2, 128, 128>}, {pipeline_mode = #tpu.pipeline_mode<synchronous>, transform_indices = @transform_4, window_bounds = array<i64: 2, 1, 128>}, {pipeline_mode = #tpu.pipeline_mode<synchronous>, transform_indices = @transform_5, window_bounds = array<i64: 128, 128>}, {pipeline_mode = #tpu.pipeline_mode<synchronous>, transform_indices = @transform_6, window_bounds = array<i64: 1, 128>}, {transform_indices = @transform_7, window_bounds = array<i64: 112, 128>}]} {
    %c0 = arith.constant 0 : index
    %c0_0 = arith.constant 0 : index
    %0 = vector.load %arg1[%c0, %c0_0] : memref<112x128xbf16, #tpu.memory_space<vmem>>, vector<112x128xbf16>
    %c0_1 = arith.constant 0 : index
    %c0_2 = arith.constant 0 : index
    %1 = vector.load %arg2[%c0_1, %c0_2] : memref<128x128xbf16, #tpu.memory_space<vmem>>, vector<128x128xbf16>
    %cst = arith.constant dense<0.000000e+00> : vector<112x128xf32>
    %2 = tpu.matmul %0, %1, %cst {dimension_numbers = #tpu.dot_dimension_numbers<[1], [0], [0], [1], [0, 0, 1, 1], [], []>} : vector<112x128xbf16>, vector<128x128xbf16>, vector<112x128xf32> -> vector<112x128xf32>
    %c0_3 = arith.constant 0 : index
    %c0_4 = arith.constant 0 : index
    %3 = vector.load %arg3[%c0_3, %c0_4] : memref<1x128xf32, #tpu.memory_space<vmem>>, vector<1x128xf32>
    %4 = vector.broadcast %3 : vector<1x128xf32> to vector<112x128xf32>
    %5 = arith.addf %2, %4 : vector<112x128xf32>
    %6 = arith.truncf %5 : vector<112x128xf32> to vector<112x128xbf16>
    %c0_5 = arith.constant 0 : index
    %c0_6 = arith.constant 0 : index
    %c0_7 = arith.constant 0 : index
    %7 = vector.load %arg4[%c0_5, %c0_6, %c0_7] : memref<2x128x128xbf16, #tpu.memory_space<vmem>>, vector<1x128x128xbf16>
    %8 = vector.shape_cast %7 : vector<1x128x128xbf16> to vector<128x128xbf16>
    %cst_8 = arith.constant dense<0.000000e+00> : vector<112x128xf32>
    %9 = tpu.matmul %6, %8, %cst_8 {dimension_numbers = #tpu.dot_dimension_numbers<[1], [0], [0], [1], [0, 0, 1, 1], [], []>} : vector<112x128xbf16>, vector<128x128xbf16>, vector<112x128xf32> -> vector<112x128xf32>
    %c0_9 = arith.constant 0 : index
    %c0_10 = arith.constant 0 : index
    %c0_11 = arith.constant 0 : index
    %10 = vector.load %arg5[%c0_9, %c0_10, %c0_11] : memref<2x1x128xf32, #tpu.memory_space<vmem>>, vector<1x1x128xf32>
    %11 = vector.shape_cast %10 : vector<1x1x128xf32> to vector<1x128xf32>
    %12 = vector.broadcast %11 : vector<1x128xf32> to vector<112x128xf32>
    %13 = arith.addf %9, %12 : vector<112x128xf32>
    %cst_12 = arith.constant 0.000000e+00 : f32
    %14 = vector.broadcast %cst_12 : f32 to vector<112x128xf32>
    %15 = arith.maximumf %13, %14 : vector<112x128xf32>
    %16 = arith.truncf %15 : vector<112x128xf32> to vector<112x128xbf16>
    %c1 = arith.constant 1 : index
    %c0_13 = arith.constant 0 : index
    %c0_14 = arith.constant 0 : index
    %17 = vector.load %arg4[%c1, %c0_13, %c0_14] : memref<2x128x128xbf16, #tpu.memory_space<vmem>>, vector<1x128x128xbf16>
    %18 = vector.shape_cast %17 : vector<1x128x128xbf16> to vector<128x128xbf16>
    %cst_15 = arith.constant dense<0.000000e+00> : vector<112x128xf32>
    %19 = tpu.matmul %16, %18, %cst_15 {dimension_numbers = #tpu.dot_dimension_numbers<[1], [0], [0], [1], [0, 0, 1, 1], [], []>} : vector<112x128xbf16>, vector<128x128xbf16>, vector<112x128xf32> -> vector<112x128xf32>
    %c1_16 = arith.constant 1 : index
    %c0_17 = arith.constant 0 : index
    %c0_18 = arith.constant 0 : index
    %20 = vector.load %arg5[%c1_16, %c0_17, %c0_18] : memref<2x1x128xf32, #tpu.memory_space<vmem>>, vector<1x1x128xf32>
    %21 = vector.shape_cast %20 : vector<1x1x128xf32> to vector<1x128xf32>
    %22 = vector.broadcast %21 : vector<1x128xf32> to vector<112x128xf32>
    %23 = arith.addf %19, %22 : vector<112x128xf32>
    %cst_19 = arith.constant 0.000000e+00 : f32
    %24 = vector.broadcast %cst_19 : f32 to vector<112x128xf32>
    %25 = arith.maximumf %23, %24 : vector<112x128xf32>
    %26 = arith.truncf %25 : vector<112x128xf32> to vector<112x128xbf16>
    %c0_20 = arith.constant 0 : index
    %c0_21 = arith.constant 0 : index
    %27 = vector.load %arg6[%c0_20, %c0_21] : memref<128x128xbf16, #tpu.memory_space<vmem>>, vector<128x128xbf16>
    %cst_22 = arith.constant dense<0.000000e+00> : vector<112x128xf32>
    %28 = tpu.matmul %26, %27, %cst_22 {dimension_numbers = #tpu.dot_dimension_numbers<[1], [0], [0], [1], [0, 0, 1, 1], [], []>} : vector<112x128xbf16>, vector<128x128xbf16>, vector<112x128xf32> -> vector<112x128xf32>
    %c0_23 = arith.constant 0 : index
    %c0_24 = arith.constant 0 : index
    %29 = vector.load %arg7[%c0_23, %c0_24] : memref<1x128xf32, #tpu.memory_space<vmem>>, vector<1x128xf32>
    %30 = vector.broadcast %29 : vector<1x128xf32> to vector<112x128xf32>
    %31 = arith.addf %28, %30 : vector<112x128xf32>
    %c0_25 = arith.constant 0 : index
    %c0_26 = arith.constant 0 : index
    %32 = vector.load %arg8[%c0_25, %c0_26] : memref<112x128xf32, #tpu.memory_space<vmem>>, vector<112x128xf32>
    tpu.vector_store %arg8[%c0_25, %c0_26], %31 {strides = array<i32>} : memref<112x128xf32, #tpu.memory_space<vmem>>, vector<112x128xf32>,
    return
  }
  func.func @transform_0(%arg0: i32) -> (i32, i32) {
    %c0_i32 = arith.constant 0 : i32
    %c0_i32_0 = arith.constant 0 : i32
    return %arg0, %c0_i32 : i32, i32
  }
  func.func @transform_1(%arg0: i32) -> (i32, i32) {
    %c0_i32 = arith.constant 0 : i32
    %c0_i32_0 = arith.constant 0 : i32
    %c0_i32_1 = arith.constant 0 : i32
    return %c0_i32, %c0_i32_0 : i32, i32
  }
  func.func @transform_2(%arg0: i32) -> (i32, i32) {
    %c0_i32 = arith.constant 0 : i32
    %c0_i32_0 = arith.constant 0 : i32
    %c0_i32_1 = arith.constant 0 : i32
    return %c0_i32, %c0_i32_0 : i32, i32
  }
  func.func @transform_3(%arg0: i32) -> (i32, i32, i32) {
    %c0_i32 = arith.constant 0 : i32
    %c0_i32_0 = arith.constant 0 : i32
    %c0_i32_1 = arith.constant 0 : i32
    %c0_i32_2 = arith.constant 0 : i32
    return %c0_i32, %c0_i32_0, %c0_i32_1 : i32, i32, i32
  }
  func.func @transform_4(%arg0: i32) -> (i32, i32, i32) {
    %c0_i32 = arith.constant 0 : i32
    %c0_i32_0 = arith.constant 0 : i32
    %c0_i32_1 = arith.constant 0 : i32
    %c0_i32_2 = arith.constant 0 : i32
    return %c0_i32, %c0_i32_0, %c0_i32_1 : i32, i32, i32
  }
  func.func @transform_5(%arg0: i32) -> (i32, i32) {
    %c0_i32 = arith.constant 0 : i32
    %c0_i32_0 = arith.constant 0 : i32
    %c0_i32_1 = arith.constant 0 : i32
    return %c0_i32, %c0_i32_0 : i32, i32
  }
  func.func @transform_6(%arg0: i32) -> (i32, i32) {
    %c0_i32 = arith.constant 0 : i32
    %c0_i32_0 = arith.constant 0 : i32
    %c0_i32_1 = arith.constant 0 : i32
    return %c0_i32, %c0_i32_0 : i32, i32
  }
  func.func @transform_7(%arg0: i32) -> (i32, i32) {
    %c0_i32 = arith.constant 0 : i32
    %c0_i32_0 = arith.constant 0 : i32
    return %arg0, %c0_i32 : i32, i32
  }
}

</mosaic_0001>

<bundles_post_ra>
// kernel: mlp_relu_dynamics.1
= control target key start
LH: loop header
LB: loop body
LE: loop exit
PB: predicated region body
PF: predicated region fallthrough
CT: control target
= control target key end

     0   :  { %s1504_s24 = smov 0   ;;  %s1778_s0 = inlined_call_operand.vmem [shape: bf16[224,128], index: 0, kind: input, shape index: {}]   ;;  %s1779_s1 = inlined_call_operand.vmem [shape: bf16[128,128], index: 1, kind: input, shape index: {}]   ;;  %s1780_s2 = inlined_call_operand.vmem [shape: f32[1,128], index: 2, kind: input, shape index: {}]   ;;  %s1781_s3 = inlined_call_operand.vmem [shape: bf16[2,128,128], index: 3, kind: input, shape index: {}]   ;;  %s1782_s4 = inlined_call_operand.vmem [shape: f32[2,1,128], index: 4, kind: input, shape index: {}]   ;;  %s1783_s5 = inlined_call_operand.vmem [shape: bf16[128,128], index: 5, kind: input, shape index: {}]   ;;  %s1784_s6 = inlined_call_operand.vmem [shape: f32[1,128], index: 6, kind: input, shape index: {}]   ;;  %s1785_s7 = inlined_call_operand.vmem [shape: f32[224,128], index: 7, kind: output, shape index: {}]  }
   0x1 LB: > { %s1100_s25 = sadd.s32 4294967295, %s1460_s24   ;;  %p1104_p0 = scmp.ge.s32.totalorder %s1460_s24, 1  ;;  %s1460_s24 = sphi %s1504_s24, %s17_s24  }
   0x2   : > { %p238_p1 = scmp.lt.s32.totalorder %s1460_s24, 3 }
   0x4   : > { %p239_p2 = pnand %p1104_p0, %p238_p1 }
   0x5   : > { %v1415_v0 = vld [vmem:[%s1779_s1] sm:$0xff] (!%p239_p2)   ;;  %v1462_v1 = vmov (!%p239_p2), 0.0   ;;  %v1416_v2 = vld [vmem:[%s1779_s1 + $0x8] sm:$0xff] (!%p239_p2)   ;;  %vm1463_vm0 = vmmov (!%p239_p2), 0   ;;  %s270_s30 = smul.u32 (!%p239_p2), 14, %s1100_s25  ;;  %v1417_v3 = vld [vmem:[%s1779_s1 + $0x10] sm:$0xff] (!%p239_p2)  }
   0x6   : > { %242 = sbr.rel (%p239_p2) target bundleno = 961 (0x3c1), region = 48  ;;  %1229 = vmatprep.subr.bf16.mxu0 (!%p239_p2), %v1462_v1  ;;  %1273 = vmatprep.subr.bf16.mxu1 (!%p239_p2), %v1462_v1  ;;  %v1430_v4 = vld [vmem:[%s1781_s3] sm:$0xff] (!%p239_p2)   ;;  %v1418_v5 = vld [vmem:[%s1779_s1 + $0x18] sm:$0xff] (!%p239_p2)   ;;  %v1431_v6 = vld [vmem:[%s1781_s3 + $0x8] sm:$0xff] (!%p239_p2)  }
   0x7   : > { %1230 = vmatpush3.bf16.msra.mxu0 (!%p239_p2), %v1415_v0  ;;  %1245 = vmatprep.mubr.msk.bf16.mxu0 (!%p239_p2), %vm1463_vm0, %v1462_v1  ;;  %p271_p3 = scmp.lt.s32.totalorder (!%p239_p2), %s270_s30, 27  ;;  %v1419_v7 = vld [vmem:[%s1779_s1 + $0x20] sm:$0xff] (!%p239_p2)   ;;  %v1432_v8 = vld [vmem:[%s1781_s3 + $0x10] sm:$0xff] (!%p239_p2)   ;;  %v1420_v9 = vld [vmem:[%s1779_s1 + $0x28] sm:$0xff] (!%p239_p2)  }
   0x8   : > { %1231 = vmatprep.subr.bf16.mxu0 (!%p239_p2), %v1462_v1  ;;  %1289 = vmatprep.mubr.msk.bf16.mxu1 (!%p239_p2), %vm1463_vm0, %v1462_v1  ;;  %v1433_v10 = vld [vmem:[%s1781_s3 + $0x18] sm:$0xff] (!%p239_p2)   ;;  %v1421_v11 = vld [vmem:[%s1779_s1 + $0x30] sm:$0xff] (!%p239_p2)   ;;  %v1434_v12 = vld [vmem:[%s1781_s3 + $0x20] sm:$0xff] (!%p239_p2)  }
   0x9   : > { %1274 = vmatpush3.bf16.msra.mxu1 (!%p239_p2), %v1430_v4  ;;  %v1422_v13 = vld [vmem:[%s1779_s1 + $0x38] sm:$0xff] (!%p239_p2)   ;;  %v1435_v14 = vld [vmem:[%s1781_s3 + $0x28] sm:$0xff] (!%p239_p2)   ;;  %v1436_v22 = vld [vmem:[%s1781_s3 + $0x30] sm:$0xff] (!%p239_p2)  }
   0xa   : > { %1275 = vmatprep.subr.bf16.mxu1 (!%p239_p2), %v1462_v1  ;;  %v1437_v23 = vld [vmem:[%s1781_s3 + $0x38] sm:$0xff] (!%p239_p2)   ;;  %v1438_v24 = vld [vmem:[%s1781_s3 + $0x40] sm:$0xff] (!%p239_p2)   ;;  %v1439_v25 = vld [vmem:[%s1781_s3 + $0x48] sm:$0xff] (!%p239_p2)  }
   0xb   : > { %1232 = vmatpush3.bf16.msra.mxu0 (!%p239_p2), %v1416_v2  ;;  %v1440_v26 = vld [vmem:[%s1781_s3 + $0x50] sm:$0xff] (!%p239_p2)   ;;  %v1441_v27 = vld [vmem:[%s1781_s3 + $0x58] sm:$0xff] (!%p239_p2)   ;;  %v1442_v28 = vld [vmem:[%s1781_s3 + $0x60] sm:$0xff] (!%p239_p2)  }
   0xc   : > { %1233 = vmatprep.subr.bf16.mxu0 (!%p239_p2), %v1462_v1  ;;  %v1443_v29 = vld [vmem:[%s1781_s3 + $0x68] sm:$0xff] (!%p239_p2)   ;;  %v1444_v30 = vld [vmem:[%s1781_s3 + $0x70] sm:$0xff] (!%p239_p2)   ;;  %v1107_v31 = vld [vmem:[%s1780_s2] ss:$0 sm:$0xff] (!%p239_p2) }
   0xd   : > { %s1787_s30 = smov (!%p271_p3, %s270_s30), 27  ;;  %1276 = vmatpush3.bf16.msra.mxu1 %v1431_v6 }
   0xe   : > { %s1105_s10 = sshll.u32 %s1787_s30, 2  ;;  %1277 = vmatprep.subr.bf16.mxu1 %v1462_v1  ;;  %s1106_s15 = sshll.u32 %s1787_s30, 3 }
   0xf   : > { %s1541_s17 = scalar_lea.vmem %s1778_s0, %s1105_s10  ;;  %1234 = vmatpush3.bf16.msra.mxu0 %v1417_v3 }
  0x10   : > { %1235 = vmatprep.subr.bf16.mxu0 %v1462_v1  ;;  %v1423_v15 = vld [vmem:[%s1541_s17] sm:$0xff]   ;;  %v1424_v16 = vld [vmem:[%s1541_s17 + $0x8] sm:$0xff]   ;;  %v1425_v17 = vld [vmem:[%s1541_s17 + $0x10] sm:$0xff]  }
  0x11   : > { %1278 = vmatpush3.bf16.msra.mxu1 %v1432_v8  ;;  %v1426_v18 = vld [vmem:[%s1541_s17 + $0x18] sm:$0xff]   ;;  %v1427_v19 = vld [vmem:[%s1541_s17 + $0x20] sm:$0xff]   ;;  %v1428_v20 = vld [vmem:[%s1541_s17 + $0x28] sm:$0xff]  }
  0x12   : > { %1279 = vmatprep.subr.bf16.mxu1 %v1462_v1  ;;  %v1429_v21 = vld [vmem:[%s1541_s17 + $0x30] sm:$0xff]   ;;  %s1759_s17 = scalar_lea.vmem %s1785_s7, %s1106_s15 }
  0x13   : > { %1236 = vmatpush3.bf16.msra.mxu0 %v1418_v5 }
  0x14   : > { %1237 = vmatprep.subr.bf16.mxu0 %v1462_v1 }
  0x15   : > { %1280 = vmatpush3.bf16.msra.mxu1 %v1433_v10 }
  0x16   : > { %1281 = vmatprep.subr.bf16.mxu1 %v1462_v1 }
  0x17   : > { %1238 = vmatpush3.bf16.msra.mxu0 %v1419_v7 }
  0x18   : > { %1239 = vmatprep.subr.bf16.mxu0 %v1462_v1 }
  0x19   : > { %1282 = vmatpush3.bf16.msra.mxu1 %v1434_v12 }
  0x1a   : > { %1283 = vmatprep.subr.bf16.mxu1 %v1462_v1 }
  0x1b   : > { %1240 = vmatpush3.bf16.msra.mxu0 %v1420_v9 }
  0x1c   : > { %1241 = vmatprep.subr.bf16.mxu0 %v1462_v1 }
  0x1d   : > { %1284 = vmatpush3.bf16.msra.mxu1 %v1435_v14 }
  0x1e   : > { %1285 = vmatprep.subr.bf16.mxu1 %v1462_v1 }
  0x1f   : > { %1242 = vmatpush3.bf16.msra.mxu0 %v1421_v11 }
  0x20   : > { %1243 = vmatprep.subr.bf16.mxu0 %v1462_v1 }
  0x21   : > { %1286 = vmatpush3.bf16.msra.mxu1 %v1436_v22  ;;  %v1449_v22 = vld [vmem:[%s1783_s5 + $0x18] sm:$0xff]  }
  0x22   : > { %1287 = vmatprep.subr.bf16.mxu1 %v1462_v1 }
  0x23   : > { %1244 = vmatpush3.bf16.msra.mxu0 %v1422_v13 }
  0x24   : > { %1317 = vmatprep.subr.bf16.mxu0 %v1462_v1 }
  0x25   : > { %1288 = vmatpush3.bf16.msra.mxu1 %v1437_v23  ;;  %v1450_v23 = vld [vmem:[%s1783_s5 + $0x20] sm:$0xff]  }
  0x26   : > { %1246 = vmatmul.mubr.bf16.vlgmr.msra.gmra.mrb[0].mxu0 %v1423_v15  ;;  %1361 = vmatprep.subr.bf16.mxu1 %v1462_v1 }
  0x27   : > { %1249 = vmatprep.mubr.msk.bf16.mxu0 %vm1463_vm0, %v1462_v1  ;;  %1318 = vmatpush3.bf16.msra.mxu0 %v1438_v24  ;;  %v1451_v24 = vld [vmem:[%s1783_s5 + $0x28] sm:$0xff]  }
  0x28   : > { %1319 = vmatprep.subr.bf16.mxu0 %v1462_v1 }
  0x2b   : > { %1320 = vmatpush3.bf16.msra.mxu0 %v1439_v25  ;;  %v1452_v25 = vld [vmem:[%s1783_s5 + $0x30] sm:$0xff]  }
  0x2c   : > { %1321 = vmatprep.subr.bf16.mxu0 %v1462_v1 }
  0x2e   : > { %1250 = vmatmul.mubr.bf16.gmra.mrb[4].mxu0 %v1424_v16 }
  0x2f   : > { %1253 = vmatprep.mubr.msk.bf16.mxu0 %vm1463_vm0, %v1462_v1  ;;  %1322 = vmatpush3.bf16.msra.mxu0 %v1440_v26  ;;  %v1690_v26 = vld [vmem:[%s1782_s4] ss:$0 sm:$0xff] }
  0x30   : > { %1323 = vmatprep.subr.bf16.mxu0 %v1462_v1 }
  0x33   : > { %1324 = vmatpush3.bf16.msra.mxu0 %v1441_v27 }
  0x34   : > { %1325 = vmatprep.subr.bf16.mxu0 %v1462_v1 }
  0x36   : > { %1254 = vmatmul.mubr.bf16.gmra.mrb[8].mxu0 %v1425_v17 }
  0x37   : > { %1257 = vmatprep.mubr.msk.bf16.mxu0 %vm1463_vm0, %v1462_v1  ;;  %1326 = vmatpush3.bf16.msra.mxu0 %v1442_v28 }
  0x38   : > { %1327 = vmatprep.subr.bf16.mxu0 %v1462_v1 }
  0x3b   : > { %1328 = vmatpush3.bf16.msra.mxu0 %v1443_v29 }
  0x3c   : > { %1329 = vmatprep.subr.bf16.mxu0 %v1462_v1 }
  0x3e   : > { %1258 = vmatmul.mubr.bf16.gmra.mrb[12].mxu0 %v1426_v18  ;;  %v1445_v18 = vld [vmem:[%s1781_s3 + $0x78] sm:$0xff]  }
  0x3f   : > { %1261 = vmatprep.mubr.msk.bf16.mxu0 %vm1463_vm0, %v1462_v1  ;;  %1330 = vmatpush3.bf16.msra.mxu0 %v1444_v30 }
  0x40   : > { %1331 = vmatprep.subr.bf16.mxu0 %v1462_v1 }
  0x43   : > { %1332 = vmatpush3.bf16.msra.mxu0 %v1445_v18 }
  0x46   : > { %1262 = vmatmul.mubr.bf16.gmra.mrb[16].mxu0 %v1427_v19  ;;  %v1446_v19 = vld [vmem:[%s1783_s5] sm:$0xff]  }
  0x47   : > { %1265 = vmatprep.mubr.msk.bf16.mxu0 %vm1463_vm0, %v1462_v1 }
  0x4e   : > { %1266 = vmatmul.mubr.bf16.gmra.mrb[20].mxu0 %v1428_v20  ;;  %v1447_v20 = vld [vmem:[%s1783_s5 + $0x8] sm:$0xff]  }
  0x4f   : > { %1269 = vmatprep.mubr.msk.bf16.mxu0 %vm1463_vm0, %v1462_v1 }
  0x56   : > { %1270 = vmatmul.mubr.bf16.gmra.mrb[24].mxu0 %v1429_v21  ;;  %v1448_v21 = vld [vmem:[%s1783_s5 + $0x10] sm:$0xff]  }
  0x57   : > { %1333 = vmatprep.mubr.msk.bf16.mxu0 %vm1463_vm0, %v1462_v1 }
  0xf9   : > { %v444_v32 = vpop.f32.mrb[0].mxu0 }
  0xfa   : > { %v1247_v33 = vpop.f32.mrb[1].mxu0  ;;  %v445_v35 = vadd.f32 %v1107_v31, %v444_v32 }
  0xfb   : > { %v447_v34 = vpop.f32.mrb[2].mxu0 }
  0xfc   : > { %v448_v36 = vadd.f32 %v1107_v31, %v447_v34  ;;  %v1248_v37 = vpop.f32.mrb[3].mxu0 }
  0xfe   : > { %v499_v38 = vpack.c.bf16 %v448_v36, %v445_v35 }
 0x100   : > { %1290 = vmatmul.mubr.bf16.vlgmr.msra.gmra.mrb[0].mxu1 %v499_v38 }
 0x101   : > { %v452_v39 = vpop.f32.mrb[4].mxu0  ;;  %1293 = vmatprep.mubr.msk.bf16.mxu1 %vm1463_vm0, %v1462_v1  ;;  %1362 = vmatpush3.bf16.msra.mxu1 %v1446_v19 }
 0x102   : > { %v1251_v40 = vpop.f32.mrb[5].mxu0  ;;  %v453_v42 = vadd.f32 %v1107_v31, %v452_v39  ;;  %1363 = vmatprep.subr.bf16.mxu1 %v1462_v1 }
 0x103   : > { %v455_v41 = vpop.f32.mrb[6].mxu0 }
 0x104   : > { %v456_v43 = vadd.f32 %v1107_v31, %v455_v41  ;;  %v1252_v44 = vpop.f32.mrb[7].mxu0 }
 0x105   : > { %1364 = vmatpush3.bf16.msra.mxu1 %v1447_v20 }
 0x106   : > { %v500_v45 = vpack.c.bf16 %v456_v43, %v453_v42  ;;  %1365 = vmatprep.subr.bf16.mxu1 %v1462_v1 }
 0x108   : > { %1294 = vmatmul.mubr.bf16.gmra.mrb[4].mxu1 %v500_v45 }
 0x109   : > { %v460_v46 = vpop.f32.mrb[8].mxu0  ;;  %1297 = vmatprep.mubr.msk.bf16.mxu1 %vm1463_vm0, %v1462_v1  ;;  %1366 = vmatpush3.bf16.msra.mxu1 %v1448_v21 }
 0x10a   : > { %v1255_v47 = vpop.f32.mrb[9].mxu0  ;;  %v461_v49 = vadd.f32 %v1107_v31, %v460_v46  ;;  %1367 = vmatprep.subr.bf16.mxu1 %v1462_v1 }
 0x10b   : > { %v463_v48 = vpop.f32.mrb[10].mxu0 }
 0x10c   : > { %v464_v50 = vadd.f32 %v1107_v31, %v463_v48  ;;  %v1256_v51 = vpop.f32.mrb[11].mxu0 }
 0x10d   : > { %1368 = vmatpush3.bf16.msra.mxu1 %v1449_v22 }
 0x10e   : > { %v501_v52 = vpack.c.bf16 %v464_v50, %v461_v49  ;;  %1369 = vmatprep.subr.bf16.mxu1 %v1462_v1 }
 0x110   : > { %1298 = vmatmul.mubr.bf16.gmra.mrb[8].mxu1 %v501_v52 }
 0x111   : > { %v468_v53 = vpop.f32.mrb[12].mxu0  ;;  %1301 = vmatprep.mubr.msk.bf16.mxu1 %vm1463_vm0, %v1462_v1  ;;  %1370 = vmatpush3.bf16.msra.mxu1 %v1450_v23 }
 0x112   : > { %v1259_v54 = vpop.f32.mrb[13].mxu0  ;;  %v469_v56 = vadd.f32 %v1107_v31, %v468_v53  ;;  %1371 = vmatprep.subr.bf16.mxu1 %v1462_v1 }
 0x113   : > { %v471_v55 = vpop.f32.mrb[14].mxu0 }
 0x114   : > { %v472_v57 = vadd.f32 %v1107_v31, %v471_v55  ;;  %v1260_v58 = vpop.f32.mrb[15].mxu0 }
 0x115   : > { %1372 = vmatpush3.bf16.msra.mxu1 %v1451_v24 }
 0x116   : > { %v502_v59 = vpack.c.bf16 %v472_v57, %v469_v56  ;;  %1373 = vmatprep.subr.bf16.mxu1 %v1462_v1 }
 0x118   : > { %1302 = vmatmul.mubr.bf16.gmra.mrb[12].mxu1 %v502_v59 }
 0x119   : > { %v476_v60 = vpop.f32.mrb[16].mxu0  ;;  %1305 = vmatprep.mubr.msk.bf16.mxu1 %vm1463_vm0, %v1462_v1  ;;  %1374 = vmatpush3.bf16.msra.mxu1 %v1452_v25 }
 0x11a   : > { %v1263_v61 = vpop.f32.mrb[17].mxu0  ;;  %v477_v63 = vadd.f32 %v1107_v31, %v476_v60  ;;  %1375 = vmatprep.subr.bf16.mxu1 %v1462_v1 }
 0x11b   : > { %v479_v62 = vpop.f32.mrb[18].mxu0 }
 0x11c   : > { %v480_v0 = vadd.f32 %v1107_v31, %v479_v62  ;;  %v1264_v2 = vpop.f32.mrb[19].mxu0 }
 0x11e   : > { %v503_v3 = vpack.c.bf16 %v480_v0, %v477_v63 }
 0x120   : > { %1306 = vmatmul.mubr.bf16.gmra.mrb[16].mxu1 %v503_v3 }
 0x121   : > { %v484_v4 = vpop.f32.mrb[20].mxu0  ;;  %1309 = vmatprep.mubr.msk.bf16.mxu1 %vm1463_vm0, %v1462_v1 }
 0x122   : > { %v1267_v5 = vpop.f32.mrb[21].mxu0  ;;  %v485_v7 = vadd.f32 %v1107_v31, %v484_v4 }
 0x123   : > { %v487_v6 = vpop.f32.mrb[22].mxu0 }
 0x124   : > { %v488_v8 = vadd.f32 %v1107_v31, %v487_v6  ;;  %v1268_v9 = vpop.f32.mrb[23].mxu0 }
 0x126   : > { %v504_v10 = vpack.c.bf16 %v488_v8, %v485_v7 }
 0x128   : > { %1310 = vmatmul.mubr.bf16.gmra.mrb[20].mxu1 %v504_v10 }
 0x129   : > { %v492_v11 = vpop.f32.mrb[24].mxu0  ;;  %1313 = vmatprep.mubr.msk.bf16.mxu1 %vm1463_vm0, %v1462_v1 }
 0x12a   : > { %v1271_v12 = vpop.f32.mrb[25].mxu0  ;;  %v493_v14 = vadd.f32 %v1107_v31, %v492_v11 }
 0x12b   : > { %v495_v13 = vpop.f32.mrb[26].mxu0 }
 0x12c   : > { %v496_v15 = vadd.f32 %v1107_v31, %v495_v13  ;;  %v1272_v16 = vpop.f32.mrb[27].mxu0 }
 0x12e   : > { %v505_v17 = vpack.c.bf16 %v496_v15, %v493_v14 }
 0x130   : > { %1314 = vmatmul.mubr.bf16.gmra.mrb[24].mxu1 %v505_v17 }
 0x131   : > { %1377 = vmatprep.mubr.msk.bf16.mxu1 %vm1463_vm0, %v1462_v1 }
 0x1d3   : > { %v611_v27 = vpop.f32.mrb[0].mxu1 }
 0x1d4   : > { %v612_v28 = vadd.f32 %v1690_v26, %v611_v27  ;;  %v1291_v29 = vpop.f32.mrb[1].mxu1 }
 0x1d5   : > { %v614_v30 = vpop.f32.mrb[2].mxu1  ;;  %v1724_v29 = vld [vmem:[%s1782_s4 + $0x1] ss:$0 sm:$0xff] }
 0x1d6   : > { %v615_v31 = vadd.f32 %v1690_v26, %v614_v30  ;;  %v1292_v32 = vpop.f32.mrb[3].mxu1  ;;  %v666_v33 = vmax.f32 %v612_v28, 0.0  ;;  %v1453_v28 = vld [vmem:[%s1783_s5 + $0x38] sm:$0xff]  }
 0x1d7   : > { %1376 = vmatpush3.bf16.msra.mxu1 %v1453_v28 }
 0x1d8   : > { %v667_v34 = vmax.f32 %v615_v31, 0.0 }
 0x1da   : > { %v680_v35 = vpack.c.bf16 %v667_v34, %v666_v33 }
 0x1db   : > { %v619_v36 = vpop.f32.mrb[4].mxu1 }
 0x1dc   : > { %v620_v37 = vadd.f32 %v1690_v26, %v619_v36  ;;  %v1295_v38 = vpop.f32.mrb[5].mxu1  ;;  %1334 = vmatmul.mubr.bf16.vlgmr.msra.gmra.mrb[28].mxu0 %v680_v35 }
 0x1dd   : > { %v622_v39 = vpop.f32.mrb[6].mxu1  ;;  %1337 = vmatprep.mubr.msk.bf16.mxu0 %vm1463_vm0, %v1462_v1 }
 0x1de   : > { %v623_v40 = vadd.f32 %v1690_v26, %v622_v39  ;;  %v1296_v41 = vpop.f32.mrb[7].mxu1  ;;  %v668_v42 = vmax.f32 %v620_v37, 0.0 }
 0x1e0   : > { %v669_v43 = vmax.f32 %v623_v40, 0.0 }
 0x1e2   : > { %v681_v44 = vpack.c.bf16 %v669_v43, %v668_v42 }
 0x1e3   : > { %v627_v45 = vpop.f32.mrb[8].mxu1 }
 0x1e4   : > { %v628_v46 = vadd.f32 %v1690_v26, %v627_v45  ;;  %v1299_v47 = vpop.f32.mrb[9].mxu1  ;;  %1338 = vmatmul.mubr.bf16.gmra.mrb[32].mxu0 %v681_v44 }
 0x1e5   : > { %v630_v48 = vpop.f32.mrb[10].mxu1  ;;  %1341 = vmatprep.mubr.msk.bf16.mxu0 %vm1463_vm0, %v1462_v1 }
 0x1e6   : > { %v631_v49 = vadd.f32 %v1690_v26, %v630_v48  ;;  %v1300_v50 = vpop.f32.mrb[11].mxu1  ;;  %v670_v51 = vmax.f32 %v628_v46, 0.0 }
 0x1e8   : > { %v671_v52 = vmax.f32 %v631_v49, 0.0 }
 0x1ea   : > { %v682_v53 = vpack.c.bf16 %v671_v52, %v670_v51 }
 0x1eb   : > { %v635_v54 = vpop.f32.mrb[12].mxu1 }
 0x1ec   : > { %v636_v55 = vadd.f32 %v1690_v26, %v635_v54  ;;  %v1303_v56 = vpop.f32.mrb[13].mxu1  ;;  %1342 = vmatmul.mubr.bf16.gmra.mrb[36].mxu0 %v682_v53 }
 0x1ed   : > { %v638_v57 = vpop.f32.mrb[14].mxu1  ;;  %1345 = vmatprep.mubr.msk.bf16.mxu0 %vm1463_vm0, %v1462_v1 }
 0x1ee   : > { %v639_v58 = vadd.f32 %v1690_v26, %v638_v57  ;;  %v1304_v59 = vpop.f32.mrb[15].mxu1  ;;  %v672_v60 = vmax.f32 %v636_v55, 0.0 }
 0x1f0   : > { %v673_v61 = vmax.f32 %v639_v58, 0.0 }
 0x1f2   : > { %v683_v62 = vpack.c.bf16 %v673_v61, %v672_v60 }
 0x1f3   : > { %v643_v63 = vpop.f32.mrb[16].mxu1 }
 0x1f4   : > { %v644_v0 = vadd.f32 %v1690_v26, %v643_v63  ;;  %v1307_v2 = vpop.f32.mrb[17].mxu1  ;;  %1346 = vmatmul.mubr.bf16.gmra.mrb[40].mxu0 %v683_v62 }
 0x1f5   : > { %v646_v3 = vpop.f32.mrb[18].mxu1  ;;  %1349 = vmatprep.mubr.msk.bf16.mxu0 %vm1463_vm0, %v1462_v1 }
 0x1f6   : > { %v647_v4 = vadd.f32 %v1690_v26, %v646_v3  ;;  %v1308_v5 = vpop.f32.mrb[19].mxu1  ;;  %v674_v6 = vmax.f32 %v644_v0, 0.0 }
 0x1f8   : > { %v675_v7 = vmax.f32 %v647_v4, 0.0 }
 0x1fa   : > { %v684_v8 = vpack.c.bf16 %v675_v7, %v674_v6 }
 0x1fb   : > { %v651_v9 = vpop.f32.mrb[20].mxu1 }
 0x1fc   : > { %v652_v10 = vadd.f32 %v1690_v26, %v651_v9  ;;  %v1311_v11 = vpop.f32.mrb[21].mxu1  ;;  %1350 = vmatmul.mubr.bf16.gmra.mrb[44].mxu0 %v684_v8 }
 0x1fd   : > { %v654_v12 = vpop.f32.mrb[22].mxu1  ;;  %1353 = vmatprep.mubr.msk.bf16.mxu0 %vm1463_vm0, %v1462_v1 }
 0x1fe   : > { %v655_v13 = vadd.f32 %v1690_v26, %v654_v12  ;;  %v1312_v14 = vpop.f32.mrb[23].mxu1  ;;  %v676_v15 = vmax.f32 %v652_v10, 0.0 }
 0x200   : > { %v677_v16 = vmax.f32 %v655_v13, 0.0 }
 0x202   : > { %v685_v17 = vpack.c.bf16 %v677_v16, %v676_v15 }
 0x203   : > { %v659_v18 = vpop.f32.mrb[24].mxu1 }
 0x204   : > { %v660_v19 = vadd.f32 %v1690_v26, %v659_v18  ;;  %v1315_v20 = vpop.f32.mrb[25].mxu1  ;;  %1354 = vmatmul.mubr.bf16.gmra.mrb[48].mxu0 %v685_v17 }
 0x205   : > { %v662_v21 = vpop.f32.mrb[26].mxu1  ;;  %1357 = vmatprep.mubr.msk.bf16.mxu0 %vm1463_vm0, %v1462_v1 }
 0x206   : > { %v663_v22 = vadd.f32 %v1690_v26, %v662_v21  ;;  %v1316_v23 = vpop.f32.mrb[27].mxu1  ;;  %v678_v24 = vmax.f32 %v660_v19, 0.0 }
 0x208   : > { %v679_v25 = vmax.f32 %v663_v22, 0.0 }
 0x20a   : > { %v686_v27 = vpack.c.bf16 %v679_v25, %v678_v24 }
 0x20c   : > { %1358 = vmatmul.mubr.bf16.gmra.mrb[52].mxu0 %v686_v27 }
 0x2af   : > { %v794_v30 = vpop.f32.mrb[28].mxu0 }
 0x2b0   : > { %v795_v31 = vadd.f32 %v1724_v29, %v794_v30  ;;  %v1335_v32 = vpop.f32.mrb[29].mxu0 }
 0x2b1   : > { %v797_v26 = vpop.f32.mrb[30].mxu0 }
 0x2b2   : > { %v798_v33 = vadd.f32 %v1724_v29, %v797_v26  ;;  %v1336_v34 = vpop.f32.mrb[31].mxu0  ;;  %v849_v35 = vmax.f32 %v795_v31, 0.0  ;;  %v1158_v31 = vld [vmem:[%s1784_s6] ss:$0 sm:$0xff] }
 0x2b4   : > { %v850_v36 = vmax.f32 %v798_v33, 0.0 }
 0x2b6   : > { %v863_v37 = vpack.c.bf16 %v850_v36, %v849_v35 }
 0x2b7   : > { %v802_v38 = vpop.f32.mrb[32].mxu0 }
 0x2b8   : > { %v803_v39 = vadd.f32 %v1724_v29, %v802_v38  ;;  %v1339_v40 = vpop.f32.mrb[33].mxu0  ;;  %1378 = vmatmul.mubr.bf16.vlgmr.msra.gmra.mrb[28].mxu1 %v863_v37 }
 0x2b9   : > { %v805_v41 = vpop.f32.mrb[34].mxu0  ;;  %1381 = vmatprep.mubr.msk.bf16.mxu1 %vm1463_vm0, %v1462_v1 }
 0x2ba   : > { %v806_v42 = vadd.f32 %v1724_v29, %v805_v41  ;;  %v1340_v43 = vpop.f32.mrb[35].mxu0  ;;  %v851_v44 = vmax.f32 %v803_v39, 0.0 }
 0x2bc   : > { %v852_v45 = vmax.f32 %v806_v42, 0.0 }
 0x2be   : > { %v864_v46 = vpack.c.bf16 %v852_v45, %v851_v44 }
 0x2bf   : > { %v810_v47 = vpop.f32.mrb[36].mxu0 }
 0x2c0   : > { %v811_v48 = vadd.f32 %v1724_v29, %v810_v47  ;;  %v1343_v49 = vpop.f32.mrb[37].mxu0  ;;  %1382 = vmatmul.mubr.bf16.gmra.mrb[32].mxu1 %v864_v46 }
 0x2c1   : > { %v813_v50 = vpop.f32.mrb[38].mxu0  ;;  %1385 = vmatprep.mubr.msk.bf16.mxu1 %vm1463_vm0, %v1462_v1 }
 0x2c2   : > { %v814_v51 = vadd.f32 %v1724_v29, %v813_v50  ;;  %v1344_v52 = vpop.f32.mrb[39].mxu0  ;;  %v853_v53 = vmax.f32 %v811_v48, 0.0 }
 0x2c4   : > { %v854_v54 = vmax.f32 %v814_v51, 0.0 }
 0x2c6   : > { %v865_v55 = vpack.c.bf16 %v854_v54, %v853_v53 }
 0x2c7   : > { %v818_v56 = vpop.f32.mrb[40].mxu0 }
 0x2c8   : > { %v819_v57 = vadd.f32 %v1724_v29, %v818_v56  ;;  %v1347_v58 = vpop.f32.mrb[41].mxu0  ;;  %1386 = vmatmul.mubr.bf16.gmra.mrb[36].mxu1 %v865_v55 }
 0x2c9   : > { %v821_v59 = vpop.f32.mrb[42].mxu0  ;;  %1389 = vmatprep.mubr.msk.bf16.mxu1 %vm1463_vm0, %v1462_v1 }
 0x2ca   : > { %v822_v60 = vadd.f32 %v1724_v29, %v821_v59  ;;  %v1348_v61 = vpop.f32.mrb[43].mxu0  ;;  %v855_v62 = vmax.f32 %v819_v57, 0.0 }
 0x2cc   : > { %v856_v63 = vmax.f32 %v822_v60, 0.0 }
 0x2ce   : > { %v866_v0 = vpack.c.bf16 %v856_v63, %v855_v62 }
 0x2cf   : > { %v826_v2 = vpop.f32.mrb[44].mxu0 }
 0x2d0   : > { %v827_v3 = vadd.f32 %v1724_v29, %v826_v2  ;;  %v1351_v4 = vpop.f32.mrb[45].mxu0  ;;  %1390 = vmatmul.mubr.bf16.gmra.mrb[40].mxu1 %v866_v0 }
 0x2d1   : > { %v829_v5 = vpop.f32.mrb[46].mxu0  ;;  %1393 = vmatprep.mubr.msk.bf16.mxu1 %vm1463_vm0, %v1462_v1 }
 0x2d2   : > { %v830_v6 = vadd.f32 %v1724_v29, %v829_v5  ;;  %v1352_v7 = vpop.f32.mrb[47].mxu0  ;;  %v857_v8 = vmax.f32 %v827_v3, 0.0 }
 0x2d4   : > { %v858_v9 = vmax.f32 %v830_v6, 0.0 }
 0x2d6   : > { %v867_v10 = vpack.c.bf16 %v858_v9, %v857_v8 }
 0x2d7   : > { %v834_v11 = vpop.f32.mrb[48].mxu0 }
 0x2d8   : > { %v835_v12 = vadd.f32 %v1724_v29, %v834_v11  ;;  %v1355_v13 = vpop.f32.mrb[49].mxu0  ;;  %1394 = vmatmul.mubr.bf16.gmra.mrb[44].mxu1 %v867_v10 }
 0x2d9   : > { %v837_v14 = vpop.f32.mrb[50].mxu0  ;;  %1397 = vmatprep.mubr.msk.bf16.mxu1 %vm1463_vm0, %v1462_v1 }
 0x2da   : > { %v838_v15 = vadd.f32 %v1724_v29, %v837_v14  ;;  %v1356_v16 = vpop.f32.mrb[51].mxu0  ;;  %v859_v17 = vmax.f32 %v835_v12, 0.0 }
 0x2dc   : > { %v860_v18 = vmax.f32 %v838_v15, 0.0 }
 0x2de   : > { %v868_v19 = vpack.c.bf16 %v860_v18, %v859_v17 }
 0x2df   : > { %v842_v20 = vpop.f32.mrb[52].mxu0 }
 0x2e0   : > { %v843_v21 = vadd.f32 %v1724_v29, %v842_v20  ;;  %v1359_v22 = vpop.f32.mrb[53].mxu0  ;;  %1398 = vmatmul.mubr.bf16.gmra.mrb[48].mxu1 %v868_v19 }
 0x2e1   : > { %v845_v23 = vpop.f32.mrb[54].mxu0  ;;  %1401 = vmatprep.mubr.msk.bf16.mxu1 %vm1463_vm0, %v1462_v1 }
 0x2e2   : > { %v846_v24 = vadd.f32 %v1724_v29, %v845_v23  ;;  %v1360_v25 = vpop.f32.mrb[55].mxu0  ;;  %v861_v27 = vmax.f32 %v843_v21, 0.0 }
 0x2e4   : > { %v862_v28 = vmax.f32 %v846_v24, 0.0 }
 0x2e6   : > { %v869_v30 = vpack.c.bf16 %v862_v28, %v861_v27 }
 0x2e8   : > { %1402 = vmatmul.mubr.bf16.gmra.mrb[52].mxu1 %v869_v30 }
 0x38b   : > { %v975_v1 = vpop.f32.mrb[28].mxu1 }
 0x38c   : > { %v976_v29 = vadd.f32 %v1158_v31, %v975_v1  ;;  %v1379_v32 = vpop.f32.mrb[29].mxu1 }
 0x38d   : > { %v978_v26 = vpop.f32.mrb[30].mxu1 }
 0x38e   : > { %1030 = vst [vmem:[%s1759_s17] sm:$0xff] %v976_v29  ;;  %v979_v33 = vadd.f32 %v1158_v31, %v978_v26  ;;  %v1380_v34 = vpop.f32.mrb[31].mxu1 }
 0x390   : > { %1031 = vst [vmem:[%s1759_s17 + $0x8] sm:$0xff] %v979_v33 }
 0x393   : > { %v983_v35 = vpop.f32.mrb[32].mxu1 }
 0x394   : > { %v984_v36 = vadd.f32 %v1158_v31, %v983_v35  ;;  %v1383_v37 = vpop.f32.mrb[33].mxu1 }
 0x395   : > { %v986_v38 = vpop.f32.mrb[34].mxu1 }
 0x396   : > { %1032 = vst [vmem:[%s1759_s17 + $0x10] sm:$0xff] %v984_v36  ;;  %v987_v39 = vadd.f32 %v1158_v31, %v986_v38  ;;  %v1384_v40 = vpop.f32.mrb[35].mxu1 }
 0x398   : > { %1033 = vst [vmem:[%s1759_s17 + $0x18] sm:$0xff] %v987_v39 }
 0x39b   : > { %v991_v41 = vpop.f32.mrb[36].mxu1 }
 0x39c   : > { %v992_v42 = vadd.f32 %v1158_v31, %v991_v41  ;;  %v1387_v43 = vpop.f32.mrb[37].mxu1 }
 0x39d   : > { %v994_v44 = vpop.f32.mrb[38].mxu1 }
 0x39e   : > { %1034 = vst [vmem:[%s1759_s17 + $0x20] sm:$0xff] %v992_v42  ;;  %v995_v45 = vadd.f32 %v1158_v31, %v994_v44  ;;  %v1388_v46 = vpop.f32.mrb[39].mxu1 }
 0x3a0   : > { %1035 = vst [vmem:[%s1759_s17 + $0x28] sm:$0xff] %v995_v45 }
 0x3a3   : > { %v999_v47 = vpop.f32.mrb[40].mxu1 }
 0x3a4   : > { %v1000_v48 = vadd.f32 %v1158_v31, %v999_v47  ;;  %v1391_v49 = vpop.f32.mrb[41].mxu1 }
 0x3a5   : > { %v1002_v50 = vpop.f32.mrb[42].mxu1 }
 0x3a6   : > { %1036 = vst [vmem:[%s1759_s17 + $0x30] sm:$0xff] %v1000_v48  ;;  %v1003_v51 = vadd.f32 %v1158_v31, %v1002_v50  ;;  %v1392_v52 = vpop.f32.mrb[43].mxu1 }
 0x3a8   : > { %1037 = vst [vmem:[%s1759_s17 + $0x38] sm:$0xff] %v1003_v51 }
 0x3ab   : > { %v1007_v53 = vpop.f32.mrb[44].mxu1 }
 0x3ac   : > { %v1008_v54 = vadd.f32 %v1158_v31, %v1007_v53  ;;  %v1395_v55 = vpop.f32.mrb[45].mxu1 }
 0x3ad   : > { %v1010_v56 = vpop.f32.mrb[46].mxu1 }
 0x3ae   : > { %1038 = vst [vmem:[%s1759_s17 + $0x40] sm:$0xff] %v1008_v54  ;;  %v1011_v57 = vadd.f32 %v1158_v31, %v1010_v56  ;;  %v1396_v58 = vpop.f32.mrb[47].mxu1 }
 0x3b0   : > { %1039 = vst [vmem:[%s1759_s17 + $0x48] sm:$0xff] %v1011_v57 }
 0x3b3   : > { %v1015_v59 = vpop.f32.mrb[48].mxu1 }
 0x3b4   : > { %v1016_v60 = vadd.f32 %v1158_v31, %v1015_v59  ;;  %v1399_v61 = vpop.f32.mrb[49].mxu1 }
 0x3b5   : > { %v1018_v62 = vpop.f32.mrb[50].mxu1 }
 0x3b6   : > { %1040 = vst [vmem:[%s1759_s17 + $0x50] sm:$0xff] %v1016_v60  ;;  %v1019_v63 = vadd.f32 %v1158_v31, %v1018_v62  ;;  %v1400_v0 = vpop.f32.mrb[51].mxu1 }
 0x3b8   : > { %1041 = vst [vmem:[%s1759_s17 + $0x58] sm:$0xff] %v1019_v63 }
 0x3bb   : > { %v1023_v2 = vpop.f32.mrb[52].mxu1 }
 0x3bc   : > { %v1024_v3 = vadd.f32 %v1158_v31, %v1023_v2  ;;  %v1403_v4 = vpop.f32.mrb[53].mxu1 }
 0x3bd   : > { %v1026_v5 = vpop.f32.mrb[54].mxu1 }
 0x3be   : > { %1042 = vst [vmem:[%s1759_s17 + $0x60] sm:$0xff] %v1024_v3  ;;  %v1027_v6 = vadd.f32 %v1158_v31, %v1026_v5  ;;  %v1404_v7 = vpop.f32.mrb[55].mxu1 }
 0x3c0   : > { %1043 = vst [vmem:[%s1759_s17 + $0x68] sm:$0xff] %v1027_v6 }
 0x3c1 PF: > { %s17_s24 = sadd.s32 1, %s1460_s24  }
 0x3c2   : > { %p14_p4 = scmp.ge.s32.totalorder %s17_s24, 4  }
 0x3c4   :  { %16 = sbr.rel (!%p14_p4) target bundleno = 1 (0x1), region = 80 }

</bundles_post_ra>
